<compile_context>
chip_gen: v7x
topology: tpu7x:2x2x1
jax: 0.10.0
libtpu: 0.0.40
codegen_flags: <defaults>
</compile_context>

<pallas_src>
import functools

import numpy as np
import jax
import jax.numpy as jnp
from jax.experimental import pallas as pl
from jax.experimental.pallas import tpu as pltpu

LANES = 128
ROW_GRANULE = 32  # tile_rows granularity; safe for f32/bf16/int8 layouts


def _round_up(a, b):
    return -(-a // b) * b


def _dice_kernel(p_ref, t_ref, o_ref, acc_inter, acc_union, *, eps):
    """Row-tiled Dice-loss reduction.

    p_ref, t_ref : (tile_rows, 128) VMEM blocks of the flattened operands
                   (original dtype; cast to f32 here).
    o_ref        : (1, 1) VMEM output, written on the last grid step only.
    acc_inter    : (1, 128) f32 per-lane partial sums of p * t.
    acc_union    : (1, 128) f32 per-lane partial sums of p + t.
    """
    i = pl.program_id(0)

    @pl.when(i == 0)
    def _init():
        acc_inter[...] = jnp.zeros_like(acc_inter)
        acc_union[...] = jnp.zeros_like(acc_union)

    p = p_ref[...].astype(jnp.float32)
    t = t_ref[...].astype(jnp.float32)
    # Cross-sublane reductions only (cheap, XLU); keep the 128-lane axis dense.
    acc_inter[...] += jnp.sum(p * t, axis=0, keepdims=True)
    acc_union[...] += jnp.sum(p + t, axis=0, keepdims=True)

    @pl.when(i == pl.num_programs(0) - 1)
    def _finalize():
        inter = jnp.sum(acc_inter[...], axis=1, keepdims=True)          # (1, 1)
        union = jnp.sum(acc_union[...], axis=1, keepdims=True) + eps    # (1, 1)
        o_ref[...] = 1.0 - inter / union


@functools.partial(jax.jit, static_argnames=("eps", "max_tile_rows"))
def dice_loss(predictive, target, eps=1e-8, max_tile_rows=4096):
    """Pallas TPU DiceLoss forward. Accepts arbitrary (matching) shapes/dtypes."""
    p = predictive.reshape(-1)
    t = target.reshape(-1)
    n = p.size  # static Python int under jit

    rows = _round_up(n, LANES) // LANES
    tile_rows = min(int(max_tile_rows), _round_up(rows, ROW_GRANULE))
    rows_p = _round_up(rows, tile_rows)
    pad = rows_p * LANES - n
    if pad:
        # zero padding is neutral for sum(p*t) and sum(p+t)
        p = jnp.pad(p, (0, pad))
        t = jnp.pad(t, (0, pad))

    p2 = p.reshape(rows_p, LANES)
    t2 = t.reshape(rows_p, LANES)
    grid = (rows_p // tile_rows,)

    out = pl.pallas_call(
        functools.partial(_dice_kernel, eps=float(eps)),
        out_shape=jax.ShapeDtypeStruct((1, 1), jnp.float32),
        grid_spec=pltpu.PrefetchScalarGridSpec(
            num_scalar_prefetch=0,
            grid=grid,
            in_specs=[
                pl.BlockSpec((tile_rows, LANES), lambda i: (i, 0)),
                pl.BlockSpec((tile_rows, LANES), lambda i: (i, 0)),
            ],
            out_specs=pl.BlockSpec((1, 1), lambda i: (0, 0)),
            scratch_shapes=[
                pltpu.VMEM((1, LANES), jnp.float32),   # acc_inter
                pltpu.VMEM((1, LANES), jnp.float32),   # acc_union
            ],
        ),
        compiler_params=pltpu.CompilerParams(
            dimension_semantics=("arbitrary",)),  # reduction axis
    )(p2, t2)
    return out[0, 0]


# ----------------------- pure-JAX reference (for checking) -------------------
def _reference_dice_loss(predictive, target, eps=1e-8):
    predictive = predictive.astype(jnp.float32)
    target = target.astype(jnp.float32)
    inter = jnp.sum(predictive * target)
    union = jnp.sum(predictive) + jnp.sum(target) + eps
    return 1.0 - inter / union


if __name__ == "__main__":
    key = jax.random.PRNGKey(0)
    k1, k2, k3, k4 = jax.random.split(key, 4)

    # 1) small shapes consistent with the module: batch=2, channels=4, 16x16
    pred = jax.nn.sigmoid(jax.random.normal(k1, (2, 4, 16, 16), jnp.float32))
    targ = (jax.random.uniform(k2, (2, 4, 16, 16)) > 0.5).astype(jnp.float32)

    out = jax.block_until_ready(dice_loss(pred, targ))
    ref = jax.block_until_ready(_reference_dice_loss(pred, targ))
    assert np.allclose(np.asarray(out), np.asarray(ref), atol=1e-6, rtol=1e-4), (
        "mismatch vs reference: got %g expected %g" % (float(out), float(ref)))

    # 2) ragged element count (exercises the zero-padding path)
    pred2 = jax.nn.sigmoid(jax.random.normal(k3, (3, 5, 70, 70), jnp.float32))
    targ2 = (jax.random.uniform(k4, (3, 5, 70, 70)) > 0.5).astype(jnp.float32)

    out2 = jax.block_until_ready(dice_loss(pred2, targ2))
    ref2 = jax.block_until_ready(_reference_dice_loss(pred2, targ2))
    assert np.allclose(np.asarray(out2), np.asarray(ref2), atol=1e-6, rtol=1e-4), (
        "mismatch vs reference (ragged): got %g expected %g"
        % (float(out2), float(ref2)))

    # 3) small tile -> multi-step grid (exercises cross-step accumulation)
    out3 = jax.block_until_ready(dice_loss(pred2, targ2, max_tile_rows=32))
    assert np.allclose(np.asarray(out3), np.asarray(ref2), atol=1e-6, rtol=1e-4), (
        "mismatch vs reference (multi-step grid): got %g expected %g"
        % (float(out3), float(ref2)))

    # 4) bf16 inputs kept in bf16 in HBM, cast to f32 inside the kernel
    pred_bf = pred2.astype(jnp.bfloat16)
    targ_bf = targ2.astype(jnp.bfloat16)
    out4 = jax.block_until_ready(dice_loss(pred_bf, targ_bf))
    ref4 = jax.block_until_ready(_reference_dice_loss(pred_bf, targ_bf))
    assert np.allclose(np.asarray(out4), np.asarray(ref4), atol=1e-5, rtol=1e-3), (
        "mismatch vs reference (bf16): got %g expected %g"
        % (float(out4), float(ref4)))

    print("KERNEL_OK")
</pallas_src>

<mosaic_0001>
module attributes {stable_mosaic.version = 11 : i64} {
  func.func @_dice_kernel(%arg0: i32, %arg1: memref<32x128xf32, #tpu.memory_space<vmem>>, %arg2: memref<32x128xf32, #tpu.memory_space<vmem>>, %arg3: memref<1x1xf32, #tpu.memory_space<vmem>>, %arg4: memref<1x128xf32, #tpu.memory_space<vmem>>, %arg5: memref<1x128xf32, #tpu.memory_space<vmem>>) attributes {dimension_semantics = [#tpu.dimension_semantics<arbitrary>], iteration_bounds = array<i64: 1>, scalar_prefetch = 0 : i64, scratch_operands = 2 : i64, tpu.core_type = #tpu.core_type<tc>, window_params = [{transform_indices = @transform_0, window_bounds = array<i64: 32, 128>}, {transform_indices = @transform_1, window_bounds = array<i64: 32, 128>}, {pipeline_mode = #tpu.pipeline_mode<synchronous>, transform_indices = @transform_2, window_bounds = array<i64: 1, 1>}]} {
    %c0_i32 = arith.constant 0 : i32
    %0 = arith.cmpi eq, %arg0, %c0_i32 : i32
    %1 = arith.extui %0 : i1 to i32
    %c0_i32_0 = arith.constant 0 : i32
    %2 = arith.cmpi ne, %1, %c0_i32_0 : i32
    scf.if %2 {
      %cst_15 = arith.constant 0.000000e+00 : f32
      %20 = vector.broadcast %cst_15 : f32 to vector<1x128xf32>
      %c0_16 = arith.constant 0 : index
      %c0_17 = arith.constant 0 : index
      %21 = vector.load %arg4[%c0_16, %c0_17] : memref<1x128xf32, #tpu.memory_space<vmem>>, vector<1x128xf32>
      tpu.vector_store %arg4[%c0_16, %c0_17], %20 {strides = array<i32>} : memref<1x128xf32, #tpu.memory_space<vmem>>, vector<1x128xf32>,
      %cst_18 = arith.constant 0.000000e+00 : f32
      %22 = vector.broadcast %cst_18 : f32 to vector<1x128xf32>
      %c0_19 = arith.constant 0 : index
      %c0_20 = arith.constant 0 : index
      %23 = vector.load %arg5[%c0_19, %c0_20] : memref<1x128xf32, #tpu.memory_space<vmem>>, vector<1x128xf32>
      tpu.vector_store %arg5[%c0_19, %c0_20], %22 {strides = array<i32>} : memref<1x128xf32, #tpu.memory_space<vmem>>, vector<1x128xf32>,
    } else {
    }
    %c0 = arith.constant 0 : index
    %c0_1 = arith.constant 0 : index
    %3 = vector.load %arg1[%c0, %c0_1] : memref<32x128xf32, #tpu.memory_space<vmem>>, vector<32x128xf32>
    %c0_2 = arith.constant 0 : index
    %c0_3 = arith.constant 0 : index
    %4 = vector.load %arg2[%c0_2, %c0_3] : memref<32x128xf32, #tpu.memory_space<vmem>>, vector<32x128xf32>
    %c0_4 = arith.constant 0 : index
    %c0_5 = arith.constant 0 : index
    %5 = vector.load %arg4[%c0_4, %c0_5] : memref<1x128xf32, #tpu.memory_space<vmem>>, vector<1x128xf32>
    %6 = arith.mulf %3, %4 : vector<32x128xf32>
    %cst = arith.constant dense<0.000000e+00> : vector<128xf32>
    %7 = vector.multi_reduction <add>, %6, %cst [0] : vector<32x128xf32> to vector<128xf32>
    %8 = vector.shape_cast %7 : vector<128xf32> to vector<1x128xf32>
    %9 = arith.addf %5, %8 : vector<1x128xf32>
    %c0_6 = arith.constant 0 : index
    %c0_7 = arith.constant 0 : index
    %10 = vector.load %arg4[%c0_6, %c0_7] : memref<1x128xf32, #tpu.memory_space<vmem>>, vector<1x128xf32>
    tpu.vector_store %arg4[%c0_6, %c0_7], %9 {strides = array<i32>} : memref<1x128xf32, #tpu.memory_space<vmem>>, vector<1x128xf32>,
    %c0_8 = arith.constant 0 : index
    %c0_9 = arith.constant 0 : index
    %11 = vector.load %arg5[%c0_8, %c0_9] : memref<1x128xf32, #tpu.memory_space<vmem>>, vector<1x128xf32>
    %12 = arith.addf %3, %4 : vector<32x128xf32>
    %cst_10 = arith.constant dense<0.000000e+00> : vector<128xf32>
    %13 = vector.multi_reduction <add>, %12, %cst_10 [0] : vector<32x128xf32> to vector<128xf32>
    %14 = vector.shape_cast %13 : vector<128xf32> to vector<1x128xf32>
    %15 = arith.addf %11, %14 : vector<1x128xf32>
    %c0_11 = arith.constant 0 : index
    %c0_12 = arith.constant 0 : index
    %16 = vector.load %arg5[%c0_11, %c0_12] : memref<1x128xf32, #tpu.memory_space<vmem>>, vector<1x128xf32>
    tpu.vector_store %arg5[%c0_11, %c0_12], %15 {strides = array<i32>} : memref<1x128xf32, #tpu.memory_space<vmem>>, vector<1x128xf32>,
    %c0_i32_13 = arith.constant 0 : i32
    %17 = arith.cmpi eq, %arg0, %c0_i32_13 : i32
    %18 = arith.extui %17 : i1 to i32
    %c0_i32_14 = arith.constant 0 : i32
    %19 = arith.cmpi ne, %18, %c0_i32_14 : i32
    scf.if %19 {
      %c0_15 = arith.constant 0 : index
      %c0_16 = arith.constant 0 : index
      %20 = vector.load %arg4[%c0_15, %c0_16] : memref<1x128xf32, #tpu.memory_space<vmem>>, vector<1x128xf32>
      %cst_17 = arith.constant dense<0.000000e+00> : vector<1xf32>
      %21 = vector.multi_reduction <add>, %20, %cst_17 [1] : vector<1x128xf32> to vector<1xf32>
      %22 = vector.shape_cast %21 : vector<1xf32> to vector<1x1xf32>
      %c0_18 = arith.constant 0 : index
      %c0_19 = arith.constant 0 : index
      %23 = vector.load %arg5[%c0_18, %c0_19] : memref<1x128xf32, #tpu.memory_space<vmem>>, vector<1x128xf32>
      %cst_20 = arith.constant dense<0.000000e+00> : vector<1xf32>
      %24 = vector.multi_reduction <add>, %23, %cst_20 [1] : vector<1x128xf32> to vector<1xf32>
      %25 = vector.shape_cast %24 : vector<1xf32> to vector<1x1xf32>
      %cst_21 = arith.constant 9.99999993E-9 : f32
      %26 = vector.broadcast %cst_21 : f32 to vector<1x1xf32>
      %27 = arith.addf %25, %26 : vector<1x1xf32>
      %28 = arith.divf %22, %27 : vector<1x1xf32>
      %cst_22 = arith.constant 1.000000e+00 : f32
      %29 = vector.broadcast %cst_22 : f32 to vector<1x1xf32>
      %30 = arith.subf %29, %28 : vector<1x1xf32>
      %c0_23 = arith.constant 0 : index
      %c0_24 = arith.constant 0 : index
      %31 = vector.load %arg3[%c0_23, %c0_24] : memref<1x1xf32, #tpu.memory_space<vmem>>, vector<1x1xf32>
      tpu.vector_store %arg3[%c0_23, %c0_24], %30 {strides = array<i32>} : memref<1x1xf32, #tpu.memory_space<vmem>>, vector<1x1xf32>,
    } else {
    }
    return
  }
  func.func @transform_0(%arg0: i32) -> (i32, i32) {
    %c0_i32 = arith.constant 0 : i32
    %c0_i32_0 = arith.constant 0 : i32
    return %arg0, %c0_i32 : i32, i32
  }
  func.func @transform_1(%arg0: i32) -> (i32, i32) {
    %c0_i32 = arith.constant 0 : i32
    %c0_i32_0 = arith.constant 0 : i32
    return %arg0, %c0_i32 : i32, i32
  }
  func.func @transform_2(%arg0: i32) -> (i32, i32) {
    %c0_i32 = arith.constant 0 : i32
    %c0_i32_0 = arith.constant 0 : i32
    %c0_i32_1 = arith.constant 0 : i32
    return %c0_i32, %c0_i32_0 : i32, i32
  }
}

</mosaic_0001>

<bundles_post_ra>
// kernel: dice_loss.1
= control target key start
LH: loop header
LB: loop body
LE: loop exit
PB: predicated region body
PF: predicated region fallthrough
CT: control target
= control target key end

     0   :  { %v118_v3 = vmov 0.0   ;;  %s171_s0 = inlined_call_operand.vmem [shape: f32[32,128], index: 0, kind: input, shape index: {}]   ;;  %s172_s1 = inlined_call_operand.vmem [shape: f32[32,128], index: 1, kind: input, shape index: {}]   ;;  %s173_s2 = inlined_call_operand.hbm [shape: f32[1,1], index: 2, kind: output, shape index: {}]  }
   0x1   :  { %v18_v0 = vld [vmem:[%s171_s0] sm:$0xff]  ;;  %v19_v1 = vld [vmem:[%s171_s0 + $0x8] sm:$0xff]  ;;  %v20_v2 = vld [vmem:[%s171_s0 + $0x10] sm:$0xff]  ;;  %17 = vst [vmem:[#allocation3] sm:$0x1] %v118_v3 }
   0x2   :  { %v21_v4 = vld [vmem:[%s171_s0 + $0x18] sm:$0xff]  ;;  %v22_v5 = vld [vmem:[%s172_s1] sm:$0xff]  ;;  %v23_v6 = vld [vmem:[%s172_s1 + $0x8] sm:$0xff]  ;;  %16 = vst [vmem:[#allocation2] sm:$0x1] %v118_v3 }
   0x3   :  { %v24_v7 = vld [vmem:[%s172_s1 + $0x10] sm:$0xff]  ;;  %v25_v8 = vld [vmem:[%s172_s1 + $0x18] sm:$0xff]  ;;  %v43_v9 = vadd.f32 %v22_v5, %v18_v0  ;;  %v44_v10 = vadd.f32 %v23_v6, %v19_v1  ;;  %v27_v11 = vmul.f32 %v22_v5, %v18_v0  ;;  %v28_v12 = vmul.f32 %v23_v6, %v19_v1 }
   0x4   :  { %7 = vsyncpa [#allocation5], 0  ;;  %v45_v13 = vadd.f32 %v24_v7, %v20_v2  ;;  %v29_v14 = vmul.f32 %v24_v7, %v20_v2  ;;  %v46_v15 = vadd.f32 %v25_v8, %v21_v4  ;;  %v30_v17 = vmul.f32 %v25_v8, %v21_v4  ;;  %s119_s0 = smov [#allocation4]  }
   0x5   :  { %v47_v16 = vadd.f32 %v44_v10, %v43_v9  ;;  %v31_v18 = vadd.f32 %v28_v12, %v27_v11  ;;  %vm62_vm0 = vcmask 1040384   ;;  %s82_s1 = sshll.u32 %s119_s0, 4  ;;  %vm74_vm1 = vcmask 0   ;;  %s83_s1 = int_to_ptr.vmem [resolvable:$true] %s82_s1 }
   0x6   :  { %s94_s25 = scalar_lea.vmem %s83_s1, 16  ;;  %s98_s26 = scalar_lea.vmem %s83_s1, 32 }
   0x7   :  { %v48_v19 = vadd.f32 %v47_v16, %v45_v13  ;;  %v32_v20 = vadd.f32 %v31_v18, %v29_v14  ;;  %p95_p0 = scmp.ne.s32.totalorder %s83_s1, %s94_s25  ;;  %p99_p1 = scmp.lt.s32.totalorder %s83_s1, %s83_s1 }
   0x8   :  { %v42_v33 = vld [vmem:[#allocation3] sm:$0x1]  ;;  %p100_p2 = scmp.lt.s32.totalorder %s98_s26, %s94_s25 }
   0x9   :  { %v49_v21 = vadd.f32 %v48_v19, %v46_v15  ;;  %v33_v22 = vadd.f32 %v32_v20, %v30_v17  ;;  %v26_v34 = vld [vmem:[#allocation2] sm:$0x1] }
   0xa   :  { %p101_p3 = por %p100_p2, %p99_p1 }
   0xb   :  { %v50_v23 = vrot.slane %v49_v21, 4  ;;  %v34_v24 = vrot.slane %v33_v22, 4 }
   0xc   :  { %p102_p4 = pnand %p101_p3, %p95_p0 }
   0xd   :  { %v51_v25 = vadd.f32 %v50_v23, %v49_v21  ;;  %v35_v26 = vadd.f32 %v34_v24, %v33_v22 }
   0xf   :  { %v52_v27 = vrot.slane %v51_v25, 2  ;;  %v36_v28 = vrot.slane %v35_v26, 2 }
  0x11   :  { %v53_v29 = vadd.f32 %v52_v27, %v51_v25  ;;  %v37_v30 = vadd.f32 %v36_v28, %v35_v26 }
  0x13   :  { %v54_v31 = vrot.slane %v53_v29, 1  ;;  %v38_v32 = vrot.slane %v37_v30, 1 }
  0x15   :  { %v55_v35 = vadd.f32 %v54_v31, %v53_v29  ;;  %v39_v36 = vadd.f32 %v38_v32, %v37_v30 }
  0x17   :  { %v56_v37 = vadd.f32 %v55_v35, %v42_v33  ;;  %v40_v38 = vadd.f32 %v39_v36, %v26_v34 }
  0x19   :  { %57 = vst [vmem:[#allocation3] sm:$0x1] %v56_v37  ;;  %41 = vst [vmem:[#allocation2] sm:$0x1] %v40_v38 }
  0x20   :  { %v66_v39 = vld [vmem:[#allocation3] sm:$0x1]  ;;  %v61_v40 = vld [vmem:[#allocation2] sm:$0x1] }
  0x21   :  { %v67_v41 = vsel %vm62_vm0, %v66_v39, 0.0  ;;  %v63_v42 = vsel %vm62_vm0, %v61_v40, 0.0 }
  0x22   :  { %68 = vadd.xlane.f32.xlu0 %v67_v41 }
  0x26   :  { %64 = vadd.xlane.f32.xlu0 %v63_v42 }
  0xaf   :  { %v69_v43 = vpop.xlane.xlu0 %68 }
  0xb0   :  { %v70_v44 = vadd.f32 1e-08, %v69_v43 }
  0xb2   :  { %92 = vrcp.f32 %v70_v44 }
  0xb3   :  { %v65_v45 = vpop.xlane.xlu0 %64 }
  0xbc   :  { %v93_v46 = vpop.eup %92 }
  0xbd   :  { %v72_v47 = vmul.f32 %v93_v46, %v65_v45 }
  0xbf   :  { %v73_v48 = vsub.f32 1.0, %v72_v47 }
  0xc1   :  { %75 = vst.msk [vmem:[#allocation4] sm:$0x1] %vm74_vm1, %v73_v48 }
  0xc2   :  { %105 = shalt.err (!%p102_p4)
}
  0xc3   :  { %s106_s29 = scalar_lea.hbm %s173_s2, 16 }
  0xc4   :  { %p107_p5 = scmp.ne.s32.totalorder %s173_s2, %s106_s29  ;;  %p110_p6 = scmp.lt.u32.totalorder %s106_s29, %s173_s2 }
  0xc6   :  { %p112_p7 = pnand %p110_p6, %p107_p5 }
  0xc8   :  { %115 = shalt.err (!%p112_p7)
}
  0xc9   :  { %85 = dma.vmem_to_hbm [thread:$0]  %s83_s1, 16, %s173_s2, [#allocation5]  }
  0xca   :  { %116 = dma.done.wait [#allocation5], 16  }
  0xcb   :  { %117 = vsyncadd [#allocation5], 4294967280 }
  0xcc   :  { %89 = vsyncpa [#allocation5], 1 }

</bundles_post_ra>
